<compile_context>
chip_gen: v6e
topology: v6e:2x2x1
jax: 0.10.0
libtpu: 0.0.40
codegen_flags: <defaults>
</compile_context>

<pallas_src>
import functools

import jax
import jax.numpy as jnp
from jax.experimental import pallas as pl
from jax.experimental.pallas import tpu as pltpu

EPS = 1e-5  # PyTorch BatchNorm2d default


def conv_stats_kernel(x_ref, wb_ref, conv_ref, stats_ref):
    """Pass 1: 3x3 conv (KH banded matmuls, lane-dense output) + BN partial stats.

    x_ref:     (1, H+2, (W+2)*Cin)     bf16 zero-padded input rows for one image
    wb_ref:    (KH, (W+2)*Cin, W*Cout) bf16 banded conv weights (dx folded into lanes)
    conv_ref:  (1, H, W*Cout)          f32 conv output, lane-dense
    stats_ref: (2, Cout)               f32 [sum, sum_sq] per channel; resident
                                       accumulator across the batch grid axis
    """
    KH = wb_ref.shape[0]
    WCout = wb_ref.shape[2]
    Hp = x_ref.shape[1]
    H = Hp - (KH - 1)
    Cout = stats_ref.shape[1]

    x = x_ref[0]  # (H+2, (W+2)*Cin) bf16, single load

    # Convolution: the dx taps are baked into the banded weight, so only KH MXU
    # matmuls remain (K=(W+2)*Cin, N=W*Cout lane-dense).  No zero-init: the first
    # tap's product seeds the accumulator.
    acc = jnp.dot(x[0:H, :], wb_ref[0], preferred_element_type=jnp.float32)
    for dy in range(1, KH):
        acc = acc + jnp.dot(x[dy:dy + H, :], wb_ref[dy],
                            preferred_element_type=jnp.float32)  # (H, W*Cout) f32

    # One-pass BN statistics: per-lane sum / sum-of-squares (sublane reduce), then
    # fold the W groups down to Cout channels with a one-hot matmul on the MXU.
    colsum = jnp.sum(acc, axis=0, keepdims=True)        # (1, W*Cout)
    colsq = jnp.sum(acc * acc, axis=0, keepdims=True)   # (1, W*Cout)
    lane_ch = jax.lax.broadcasted_iota(jnp.int32, (WCout, Cout), 0) % Cout
    col_ch = jax.lax.broadcasted_iota(jnp.int32, (WCout, Cout), 1)
    sel = (lane_ch == col_ch).astype(jnp.float32)        # (W*Cout, Cout) one-hot
    partial = jnp.dot(jnp.concatenate([colsum, colsq], axis=0), sel,
                      preferred_element_type=jnp.float32)  # (2, Cout)

    @pl.when(pl.program_id(0) == 0)
    def _():
        stats_ref[...] = jnp.zeros_like(stats_ref)

    stats_ref[...] += partial
    conv_ref[0] = acc


def bn_relu_kernel(conv_ref, stats_ref, gamma_ref, beta_ref, o_ref, *, inv_count):
    """Pass 2: BatchNorm with global batch stats (biased var) + affine + ReLU, lane-dense.

    conv_ref:  (1, H, W*Cout) f32    stats_ref: (2, Cout) f32
    gamma/beta: (1, Cout) f32        o_ref: (1, H, W*Cout)
    """
    Cout = stats_ref.shape[1]
    WCout = conv_ref.shape[2]

    mean = stats_ref[0:1, :] * inv_count                      # (1, Cout)
    var = stats_ref[1:2, :] * inv_count - mean * mean         # biased var (train-mode BN)
    inv = jax.lax.rsqrt(var + EPS)
    a = gamma_ref[...] * inv                                  # (1, Cout)
    b = beta_ref[...] - mean * a                              # (1, Cout)

    # Broadcast per-channel scale/shift to per-lane (W*Cout) vectors with a one-hot
    # matmul so the channel-tiling rides the MXU instead of a lane relayout.
    row_ch = jax.lax.broadcasted_iota(jnp.int32, (Cout, WCout), 0)
    lane_ch = jax.lax.broadcasted_iota(jnp.int32, (Cout, WCout), 1) % Cout
    sel_t = (row_ch == lane_ch).astype(jnp.float32)           # (Cout, W*Cout)
    ab = jnp.dot(jnp.concatenate([a, b], axis=0), sel_t,
                 preferred_element_type=jnp.float32)          # (2, W*Cout)

    y = conv_ref[0] * ab[0:1, :] + ab[1:2, :]                 # (H, W*Cout)
    o_ref[0] = jnp.maximum(y, 0.0).astype(o_ref.dtype)


def _banded_weights(w_oihw, W):
    """Fold the kernel-x taps into KH banded ((W+2)*Cin, W*Cout) matrices so the dx
    shift is realized inside the matmul (no per-tap slice/relayout inside the kernel)."""
    Cout, Cin, KH, KW = w_oihw.shape
    Wp = W + KW - 1
    w_hwio = jnp.transpose(w_oihw, (2, 3, 1, 0)).astype(jnp.float32)  # (KH,KW,Cin,Cout)
    xi = jnp.arange(Wp)
    xo = jnp.arange(W)
    dx = xi[:, None] - xo[None, :]                                    # (Wp, W)
    valid = (dx >= 0) & (dx < KW)
    band = w_hwio[:, jnp.clip(dx, 0, KW - 1), :, :]                   # (KH,Wp,W,Cin,Cout)
    band = band * valid[None, :, :, None, None].astype(jnp.float32)
    band = jnp.transpose(band, (0, 1, 3, 2, 4))                       # (KH,Wp,Cin,W,Cout)
    return band.reshape(KH, Wp * Cin, W * Cout)


def conv2d_block_forward(x_nchw, w_oihw, gamma, beta):
    """Forward of conv2d_block(in_ch, out_ch, kernel_size=3, activation=True)."""
    N, Cin, H, W = x_nchw.shape
    Cout, _, KH, KW = w_oihw.shape
    Hp, Wp = H + KH - 1, W + KW - 1
    WCout = W * Cout

    # Layout plumbing: NCHW -> padded channels-last rows; bf16 feed for the MXU
    # (halves activation HBM/VMEM traffic; accumulation and BN stay f32).
    x_nhwc = jnp.transpose(x_nchw, (0, 2, 3, 1))
    xp = jnp.pad(x_nhwc, ((0, 0), (1, 1), (1, 1), (0, 0)))            # (N, H+2, W+2, Cin)
    x_rows = xp.reshape(N, Hp, Wp * Cin).astype(jnp.bfloat16)
    wband = _banded_weights(w_oihw, W).astype(jnp.bfloat16)

    # Pass 1: conv + global per-channel sum/sumsq, gridded over the batch.
    # Stats output keeps the same block index every step -> resident accumulator,
    # so the batch axis must be "arbitrary".  (For v7x megacore, per-core partial
    # stats + a tiny combine would allow "parallel" here; not needed at these sizes.)
    conv_flat, stats = pl.pallas_call(
        conv_stats_kernel,
        out_shape=(jax.ShapeDtypeStruct((N, H, WCout), jnp.float32),
                   jax.ShapeDtypeStruct((2, Cout), jnp.float32)),
        grid=(N,),
        in_specs=[
            pl.BlockSpec((1, Hp, Wp * Cin), lambda n: (n, 0, 0)),
            pl.BlockSpec((KH, Wp * Cin, WCout), lambda n: (0, 0, 0)),
        ],
        out_specs=(
            pl.BlockSpec((1, H, WCout), lambda n: (n, 0, 0)),
            pl.BlockSpec((2, Cout), lambda n: (0, 0)),
        ),
        compiler_params=pltpu.CompilerParams(
            dimension_semantics=("arbitrary",)),
    )(x_rows, wband)

    # Pass 2: normalize with the global batch statistics + ReLU.  Steps are
    # independent -> "parallel" (megacore-shardable on v7x).
    out_flat = pl.pallas_call(
        functools.partial(bn_relu_kernel, inv_count=1.0 / float(N * H * W)),
        out_shape=jax.ShapeDtypeStruct((N, H, WCout), x_nchw.dtype),
        grid=(N,),
        in_specs=[
            pl.BlockSpec((1, H, WCout), lambda n: (n, 0, 0)),
            pl.BlockSpec((2, Cout), lambda n: (0, 0)),
            pl.BlockSpec((1, Cout), lambda n: (0, 0)),
            pl.BlockSpec((1, Cout), lambda n: (0, 0)),
        ],
        out_specs=pl.BlockSpec((1, H, WCout), lambda n: (n, 0, 0)),
        compiler_params=pltpu.CompilerParams(
            dimension_semantics=("parallel",)),
    )(conv_flat, stats,
      gamma.reshape(1, Cout).astype(jnp.float32),
      beta.reshape(1, Cout).astype(jnp.float32))

    # Back to the PyTorch NCHW interface.
    return out_flat.reshape(N, H, W, Cout).transpose(0, 3, 1, 2)


def reference_forward(x_nchw, w_oihw, gamma, beta):
    """Pure-JAX reference (f32) for correctness checking."""
    conv = jax.lax.conv_general_dilated(
        x_nchw.astype(jnp.float32), w_oihw.astype(jnp.float32),
        window_strides=(1, 1), padding=((1, 1), (1, 1)),
        dimension_numbers=("NCHW", "OIHW", "NCHW"))
    mean = conv.mean(axis=(0, 2, 3), keepdims=True)
    var = conv.var(axis=(0, 2, 3), keepdims=True)   # biased, as in BN forward
    y = (conv - mean) * jax.lax.rsqrt(var + EPS)
    y = y * gamma.reshape(1, -1, 1, 1) + beta.reshape(1, -1, 1, 1)
    return jnp.maximum(y, 0.0)


if __name__ == "__main__":
    # Small shapes consistent with the module: batch=2, in_ch=4, out_ch=8, 16x16.
    N, Cin, Cout, H, W, K = 2, 4, 8, 16, 16, 3

    key = jax.random.PRNGKey(0)
    kx, kw = jax.random.split(key)
    x = jax.random.normal(kx, (N, Cin, H, W), dtype=jnp.float32)
    w = jax.random.normal(kw, (Cout, Cin, K, K), dtype=jnp.float32) * (1.0 / (Cin * K * K) ** 0.5)
    gamma = jnp.ones((Cout,), dtype=jnp.float32)
    beta = jnp.zeros((Cout,), dtype=jnp.float32)

    out = jax.block_until_ready(conv2d_block_forward(x, w, gamma, beta))
    assert out.shape == (N, Cout, H, W), out.shape

    # Tight check: reference with the same bf16 input quantization the kernel uses.
    xq = x.astype(jnp.bfloat16).astype(jnp.float32)
    wq = w.astype(jnp.bfloat16).astype(jnp.float32)
    ref_q = reference_forward(xq, wq, gamma, beta)
    assert jnp.allclose(out, ref_q, atol=2e-3, rtol=2e-3), float(jnp.max(jnp.abs(out - ref_q)))

    # Loose sanity check against full-f32 module semantics (bf16 MXU feed tolerance).
    ref = reference_forward(x, w, gamma, beta)
    assert jnp.allclose(out, ref, atol=5e-2, rtol=5e-2), float(jnp.max(jnp.abs(out - ref)))

    print("KERNEL_OK")
</pallas_src>

<mosaic_0001>
module attributes {stable_mosaic.version = 11 : i64} {
  func.func @conv_stats_kernel(%arg0: i32, %arg1: memref<1x18x72xbf16, #tpu.memory_space<vmem>>, %arg2: memref<3x72x128xbf16, #tpu.memory_space<vmem>>, %arg3: memref<1x16x128xf32, #tpu.memory_space<vmem>>, %arg4: memref<2x8xf32, #tpu.memory_space<vmem>>) attributes {dimension_semantics = [#tpu.dimension_semantics<arbitrary>], iteration_bounds = array<i64: 2>, scalar_prefetch = 0 : i64, scratch_operands = 0 : i64, tpu.core_type = #tpu.core_type<tc>, window_params = [{transform_indices = @transform_0, window_bounds = array<i64: 1, 18, 72>}, {pipeline_mode = #tpu.pipeline_mode<synchronous>, transform_indices = @transform_1, window_bounds = array<i64: 3, 72, 128>}, {transform_indices = @transform_2, window_bounds = array<i64: 1, 16, 128>}, {pipeline_mode = #tpu.pipeline_mode<synchronous>, transform_indices = @transform_3, window_bounds = array<i64: 2, 8>}]} {
    %c0 = arith.constant 0 : index
    %c0_0 = arith.constant 0 : index
    %c0_1 = arith.constant 0 : index
    %0 = vector.load %arg1[%c0, %c0_0, %c0_1] : memref<1x18x72xbf16, #tpu.memory_space<vmem>>, vector<1x18x72xbf16>
    %1 = vector.shape_cast %0 : vector<1x18x72xbf16> to vector<18x72xbf16>
    %2 = vector.extract_strided_slice %1 {offsets = [0, 0], sizes = [16, 72], strides = [1, 1]} : vector<18x72xbf16> to vector<16x72xbf16>
    %c0_2 = arith.constant 0 : index
    %c0_3 = arith.constant 0 : index
    %c0_4 = arith.constant 0 : index
    %3 = vector.load %arg2[%c0_2, %c0_3, %c0_4] : memref<3x72x128xbf16, #tpu.memory_space<vmem>>, vector<1x72x128xbf16>
    %4 = vector.shape_cast %3 : vector<1x72x128xbf16> to vector<72x128xbf16>
    %cst = arith.constant dense<0.000000e+00> : vector<16x128xf32>
    %5 = tpu.matmul %2, %4, %cst {dimension_numbers = #tpu.dot_dimension_numbers<[1], [0], [0], [1], [0, 0, 1, 1], [], []>} : vector<16x72xbf16>, vector<72x128xbf16>, vector<16x128xf32> -> vector<16x128xf32>
    %6 = vector.extract_strided_slice %1 {offsets = [1, 0], sizes = [16, 72], strides = [1, 1]} : vector<18x72xbf16> to vector<16x72xbf16>
    %c1 = arith.constant 1 : index
    %c0_5 = arith.constant 0 : index
    %c0_6 = arith.constant 0 : index
    %7 = vector.load %arg2[%c1, %c0_5, %c0_6] : memref<3x72x128xbf16, #tpu.memory_space<vmem>>, vector<1x72x128xbf16>
    %8 = vector.shape_cast %7 : vector<1x72x128xbf16> to vector<72x128xbf16>
    %cst_7 = arith.constant dense<0.000000e+00> : vector<16x128xf32>
    %9 = tpu.matmul %6, %8, %cst_7 {dimension_numbers = #tpu.dot_dimension_numbers<[1], [0], [0], [1], [0, 0, 1, 1], [], []>} : vector<16x72xbf16>, vector<72x128xbf16>, vector<16x128xf32> -> vector<16x128xf32>
    %10 = arith.addf %5, %9 : vector<16x128xf32>
    %11 = vector.extract_strided_slice %1 {offsets = [2, 0], sizes = [16, 72], strides = [1, 1]} : vector<18x72xbf16> to vector<16x72xbf16>
    %c2 = arith.constant 2 : index
    %c0_8 = arith.constant 0 : index
    %c0_9 = arith.constant 0 : index
    %12 = vector.load %arg2[%c2, %c0_8, %c0_9] : memref<3x72x128xbf16, #tpu.memory_space<vmem>>, vector<1x72x128xbf16>
    %13 = vector.shape_cast %12 : vector<1x72x128xbf16> to vector<72x128xbf16>
    %cst_10 = arith.constant dense<0.000000e+00> : vector<16x128xf32>
    %14 = tpu.matmul %11, %13, %cst_10 {dimension_numbers = #tpu.dot_dimension_numbers<[1], [0], [0], [1], [0, 0, 1, 1], [], []>} : vector<16x72xbf16>, vector<72x128xbf16>, vector<16x128xf32> -> vector<16x128xf32>
    %15 = arith.addf %10, %14 : vector<16x128xf32>
    %cst_11 = arith.constant dense<0.000000e+00> : vector<128xf32>
    %16 = vector.multi_reduction <add>, %15, %cst_11 [0] : vector<16x128xf32> to vector<128xf32>
    %17 = vector.shape_cast %16 : vector<128xf32> to vector<1x128xf32>
    %18 = arith.mulf %15, %15 : vector<16x128xf32>
    %cst_12 = arith.constant dense<0.000000e+00> : vector<128xf32>
    %19 = vector.multi_reduction <add>, %18, %cst_12 [0] : vector<16x128xf32> to vector<128xf32>
    %20 = vector.shape_cast %19 : vector<128xf32> to vector<1x128xf32>
    %21 = tpu.iota {dimensions = array<i32: 0>} : vector<128x8xi32>
    %c8_i32 = arith.constant 8 : i32
    %c0_i32 = arith.constant 0 : i32
    %22 = arith.cmpi eq, %c8_i32, %c0_i32 : i32
    %c1_i32 = arith.constant 1 : i32
    %23 = arith.select %22, %c1_i32, %c8_i32 : i32
    %24 = vector.broadcast %23 : i32 to vector<128x8xi32>
    %25 = arith.remsi %21, %24 : vector<128x8xi32>
    %c0_i32_13 = arith.constant 0 : i32
    %26 = vector.broadcast %c0_i32_13 : i32 to vector<128x8xi32>
    %27 = arith.cmpi ne, %25, %26 : vector<128x8xi32>
    %c0_i32_14 = arith.constant 0 : i32
    %28 = vector.broadcast %c0_i32_14 : i32 to vector<128x8xi32>
    %29 = arith.cmpi slt, %25, %28 : vector<128x8xi32>
    %c0_i32_15 = arith.constant 0 : i32
    %30 = arith.cmpi slt, %23, %c0_i32_15 : i32
    %31 = vector.broadcast %30 : i1 to vector<128x8xi1>
    %32 = vector.broadcast %31 : vector<128x8xi1> to vector<128x8xi1>
    %33 = arith.xori %29, %32 : vector<128x8xi1>
    %34 = arith.andi %33, %27 : vector<128x8xi1>
    %35 = vector.broadcast %23 : i32 to vector<128x8xi32>
    %36 = arith.addi %25, %35 : vector<128x8xi32>
    %37 = arith.select %34, %36, %25 : vector<128x8xi1>, vector<128x8xi32>
    %38 = tpu.iota {dimensions = array<i32: 1>} : vector<128x8xi32>
    %39 = arith.cmpi eq, %37, %38 : vector<128x8xi32>
    %40 = arith.extui %39 : vector<128x8xi1> to vector<128x8xi32>
    %41 = arith.sitofp %40 : vector<128x8xi32> to vector<128x8xf32>
    %42 = tpu.concatenate %17, %20 in 0 : vector<1x128xf32>, vector<1x128xf32> -> vector<2x128xf32>
    %cst_16 = arith.constant dense<0.000000e+00> : vector<2x8xf32>
    %43 = tpu.matmul %42, %41, %cst_16 {dimension_numbers = #tpu.dot_dimension_numbers<[1], [0], [0], [1], [0, 0, 1, 1], [], []>} : vector<2x128xf32>, vector<128x8xf32>, vector<2x8xf32> -> vector<2x8xf32>
    %c0_i32_17 = arith.constant 0 : i32
    %44 = arith.cmpi eq, %arg0, %c0_i32_17 : i32
    %45 = arith.extui %44 : i1 to i32
    %c0_i32_18 = arith.constant 0 : i32
    %46 = arith.cmpi ne, %45, %c0_i32_18 : i32
    scf.if %46 {
      %cst_26 = arith.constant 0.000000e+00 : f32
      %53 = vector.broadcast %cst_26 : f32 to vector<2x8xf32>
      %c0_27 = arith.constant 0 : index
      %c0_28 = arith.constant 0 : index
      %54 = vector.load %arg4[%c0_27, %c0_28] : memref<2x8xf32, #tpu.memory_space<vmem>>, vector<2x8xf32>
      tpu.vector_store %arg4[%c0_27, %c0_28], %53 {strides = array<i32>} : memref<2x8xf32, #tpu.memory_space<vmem>>, vector<2x8xf32>,
    } else {
    }
    %c0_19 = arith.constant 0 : index
    %c0_20 = arith.constant 0 : index
    %47 = vector.load %arg4[%c0_19, %c0_20] : memref<2x8xf32, #tpu.memory_space<vmem>>, vector<2x8xf32>
    %48 = arith.addf %47, %43 : vector<2x8xf32>
    %c0_21 = arith.constant 0 : index
    %c0_22 = arith.constant 0 : index
    %49 = vector.load %arg4[%c0_21, %c0_22] : memref<2x8xf32, #tpu.memory_space<vmem>>, vector<2x8xf32>
    tpu.vector_store %arg4[%c0_21, %c0_22], %48 {strides = array<i32>} : memref<2x8xf32, #tpu.memory_space<vmem>>, vector<2x8xf32>,
    %c0_23 = arith.constant 0 : index
    %c0_24 = arith.constant 0 : index
    %c0_25 = arith.constant 0 : index
    %50 = vector.load %arg3[%c0_23, %c0_24, %c0_25] : memref<1x16x128xf32, #tpu.memory_space<vmem>>, vector<1x16x128xf32>
    %51 = vector.shape_cast %50 : vector<1x16x128xf32> to vector<16x128xf32>
    %52 = vector.shape_cast %15 : vector<16x128xf32> to vector<1x16x128xf32>
    tpu.vector_store %arg3[%c0_23, %c0_24, %c0_25], %52 {strides = array<i32>} : memref<1x16x128xf32, #tpu.memory_space<vmem>>, vector<1x16x128xf32>,
    return
  }
  func.func @transform_0(%arg0: i32) -> (i32, i32, i32) {
    %c0_i32 = arith.constant 0 : i32
    %c0_i32_0 = arith.constant 0 : i32
    %c0_i32_1 = arith.constant 0 : i32
    return %arg0, %c0_i32, %c0_i32_0 : i32, i32, i32
  }
  func.func @transform_1(%arg0: i32) -> (i32, i32, i32) {
    %c0_i32 = arith.constant 0 : i32
    %c0_i32_0 = arith.constant 0 : i32
    %c0_i32_1 = arith.constant 0 : i32
    %c0_i32_2 = arith.constant 0 : i32
    return %c0_i32, %c0_i32_0, %c0_i32_1 : i32, i32, i32
  }
  func.func @transform_2(%arg0: i32) -> (i32, i32, i32) {
    %c0_i32 = arith.constant 0 : i32
    %c0_i32_0 = arith.constant 0 : i32
    %c0_i32_1 = arith.constant 0 : i32
    return %arg0, %c0_i32, %c0_i32_0 : i32, i32, i32
  }
  func.func @transform_3(%arg0: i32) -> (i32, i32) {
    %c0_i32 = arith.constant 0 : i32
    %c0_i32_0 = arith.constant 0 : i32
    %c0_i32_1 = arith.constant 0 : i32
    return %c0_i32, %c0_i32_0 : i32, i32
  }
}

</mosaic_0001>

<bundles_post_ra>
// kernel: tpu_custom_call.1
= control target key start
LH: loop header
LB: loop body
LE: loop exit
PB: predicated region body
PF: predicated region fallthrough
CT: control target
= control target key end

     0   :  { %9 = vsyncpa [#allocation3], 0  ;;  %s1590_s0 = inlined_call_operand.vmem [shape: bf16[2,18,72], index: 0, kind: input, shape index: {}]   ;;  %s1591_s1 = inlined_call_operand.hbm [shape: bf16[3,72,128], index: 1, kind: input, shape index: {}]   ;;  %s1592_s2 = inlined_call_operand.hbm [shape: f32[2,16,128], index: 2, kind: output, shape index: {0}]   ;;  %s1593_s3 = inlined_call_operand.hbm [shape: f32[2,8], index: 3, kind: output, shape index: {1}]  }
   0x1   :  { %10 = vsyncpa [#allocation4], 0 }
   0x2   :  { %12 = vsyncpa [#allocation4 + $0x1], 0 }
   0x3   :  { %13 = vsyncpa [#allocation7], 0  ;;  %s1350_s12 = smov 0   ;;  %s1352_s13 = smov 0  }
   0x4   :  { %s1354_s14 = smov 0   ;;  %s1356_s15 = smov 0  }
   0x5 LB: > { %s1371_s16 = sadd.s32 4294967295, %s1317_s15   ;;  %s935_s17 = sadd.s32 4294967294, %s1317_s15   ;;  %s1317_s15 = sphi %s1356_s15, %s1607_s15   ;;  %s1313_s14 = sphi %s1354_s14, %s1606_s14   ;;  %s1309_s13 = sphi %s1352_s13, %s1605_s13   ;;  %s1305_s12 = sphi %s1350_s12, %s1604_s12  }
   0x6   : > { %s1375_s18 = sadd.s32 1, %s1317_s15   ;;  %s73_s19 = sadd.s32 1, %s1313_s14 }
   0x7   : > { %s70_s20 = ssub.s32 %s1317_s15, %s1375_s18  ;;  %p83_p0 = scmp.ne.s32.totalorder %s1313_s14, %s1309_s13 }
   0x8   : > { %p71_p1 = scmp.eq.s32.totalorder %s70_s20, 0  ;;  %p1594_p2 = scmp.eq.s32.totalorder %s1371_s16, 1 }
   0x9   : > { %p89_p3 = scmp.ne.s32.totalorder %s1309_s13, %s1305_s12  ;;  %p90_p4 = scmp.eq.s32.totalorder %s935_s17, 1 }
   0xa   : > { %s1386_s21 = scalar_select %p71_p1, %s1313_s14, %s73_s19  }
   0xb   : > { %p1390_p5 = por %p1594_p2, %p83_p0  ;;  %p1394_p6 = por %p90_p4, %p89_p3 }
   0xc   : > { %p936_p7 = scmp.ge.s32.totalorder %s1317_s15, 1  ;;  %p118_p8 = scmp.lt.s32.totalorder %s1317_s15, 3 }
   0xd   : > { %s1596_s23 = scalar_select %p1394_p6, 1, 0 }
   0xe   : > { %p1135_p10 = scmp.eq.s32.totalorder %s1371_s16, 0  ;;  %p1402_p11 = pnand %p936_p7, %p118_p8 }
   0xf   : > { %s1319_s25 = smov [#allocation2]  }
  0x10   : > { %s130_s26 = sshll.u32 %s1319_s25, 4  ;;  %p1127_p12 = pneg %p1402_p11  ;;  %s131_s26 = int_to_ptr.vmem [resolvable:$true] %s130_s26 }
  0x11   : > { %s1210_s27 = scalar_lea.vmem %s131_s26, 1728  ;;  %p1218_p2 = scmp.lt.s32.totalorder %s131_s26, %s131_s26 }
  0x12   : > { %p1128_p13 = pnand %p1135_p10, %p1127_p12  ;;  %p1211_p1 = scmp.ne.s32.totalorder %s131_s26, %s1210_s27 }
  0x13   : > { %p1219_p9 = scmp.lt.s32.totalorder %s1210_s27, %s1210_s27 }
  0x14   : > { %p1201_p0 = pneg %p1128_p13 }
  0x15   : > { %p1220_p6 = por %p1219_p9, %p1218_p2 }
  0x16   : > { %p1213_p3 = pnand %p1211_p1, %p1201_p0 }
  0x18   : > { %p1214_p4 = pneg %p1213_p3 }
  0x1a   : > { %p1221_p7 = pnand %p1220_p6, %p1214_p4 }
  0x1c   : > { %1224 = shalt.err (!%p1221_p7)
}
  0x1d   : > { %s1320_s28 = smov 64   ;;  %s1321_s29 = smov 4  }
  0x1e   : > { %1130 = dma.hbm_to_vmem [thread:$0]  (!%p1128_p13), %s1591_s1, 1728, %s131_s26, [#allocation3], %s1320_s28, %s1320_s28, %s1321_s29  }
  0x1f   : > { %154 = sbr.rel (%p1402_p11) target bundleno = 535 (0x217), region = 28 }
  0x24   : > { %1292 = dma.done.wait (%p1135_p10), [#allocation3], 1728  }
  0x25   : > { %1294 = vsyncadd (%p1135_p10), [#allocation3], 4294965568  ;;  %s173_s5 = sand.u32 1, %s1309_s13   ;;  %v1322_v0 = vmov 0.0   ;;  %p178_p2 = scmp.lt.s32.totalorder %s1371_s16, 1  ;;  %vm1323_vm0 = vmmov 0   ;;  %v482_v31 = vlaneseq }
  0x26   : > { %s1422_s6 = sshll.u32 %s173_s5, 4  ;;  %1039 = vmatprep.subr.bf16.mxu0 %v1322_v0  ;;  %1053 = vmatprep.subr.bf16.mxu1 %v1322_v0  ;;  %vm258_vm1 = vcmask 1043456   ;;  %v1182_v1 = vld [vmem:[#allocation2 + $0x44] ss:$0 sps:$4 sm:$0xff]   ;;  %v1183_v2 = vld [vmem:[#allocation2 + $0x20] ss:$0 sps:$4 sm:$0xff]  }
  0x27   : > { %1049 = vmatprep.mubr.msk.bf16.mxu0 %vm1323_vm0, %v1322_v0  ;;  %1063 = vmatprep.mubr.msk.bf16.mxu1 %vm1323_vm0, %v1322_v0  ;;  %s179_s7 = scalar_select %p178_p2, %s1371_s16, 1  ;;  %v260_v3 = vsel %vm258_vm1, %v1182_v1, 0  ;;  %v333_v4 = vsel %vm258_vm1, %v1183_v2, 0  ;;  %v1184_v5 = vld [vmem:[#allocation2 + $0x3c] sm:$0xff]   ;;  %v1186_v7 = vld [vmem:[#allocation2 + $0x34] sm:$0xff]   ;;  %v1188_v11 = vld [vmem:[#allocation2 + $0x2c] sm:$0xff]  }
  0x28   : > { %1040 = vmatpush3.bf16.msra.mxu0 %v260_v3  ;;  %1054 = vmatpush3.bf16.msra.mxu1 %v333_v4  ;;  %v1185_v6 = vld [vmem:[#allocation2 + $0x18] sm:$0xff]   ;;  %v1187_v8 = vld [vmem:[#allocation2 + $0x10] sm:$0xff]   ;;  %v1189_v12 = vld [vmem:[#allocation2 + $0x8] sm:$0xff]   ;;  %vm214_vm2 = vsmask.f32 7424  ;;  %vm254_vm3 = vcmask 588800  }
  0x29   : > { %s1116_s8 = smul.u32 12, %s179_s7  ;;  %1041 = vmatprep.subr.bf16.mxu0 %v1322_v0  ;;  %1055 = vmatprep.subr.bf16.mxu1 %v1322_v0  ;;  %v1190_v17 = vld [vmem:[#allocation2 + $0x24] sm:$0xff]   ;;  %v1196_v25 = vld [vmem:[#allocation2 + $0x58] sm:$0xff]   ;;  %v1197_v26 = vld [vmem:[#allocation2 + $0x50] sm:$0xff]   ;;  %vm386_vm4 = vcmask 1046528   ;;  %v1459_v32 = vshrl.u32 %v482_v31, 7 }
  0x2a   : > { %v1191_v19 = vld [vmem:[#allocation2] sm:$0xff]   ;;  %v1194_v21 = vld [vmem:[#allocation2 + $0x68] ss:$0 sps:$4 sm:$0xff]   ;;  %v1461_v33 = vand.u32 127, %v482_v31  ;;  %v1324_v42 = vmov 1.0   ;;  %s175_s17 = scalar_lea.vmem [#allocation5], %s1422_s6 }
  0x2b   : > { %s182_s11 = scalar_lea.vmem %s1590_s0, %s1116_s8  ;;  %v421_v23 = vsel %vm258_vm1, %v1194_v21, 0  ;;  %v1195_v24 = vld [vmem:[#allocation2 + $0x60] sm:$0xff]   ;;  %v1198_v27 = vld [vmem:[#allocation2 + $0x48] sm:$0xff]   ;;  %v498_v34 = vadd.s32 120, %v1459_v32  ;;  %v497_v35 = vadd.s32 112, %v1459_v32  ;;  %v496_v36 = vadd.s32 104, %v1459_v32 }
  0x2c   : > { %1042 = vmatpush3.bf16.msra.mxu0 %v1184_v5  ;;  %1056 = vmatpush3.bf16.msra.mxu1 %v1185_v6  ;;  %v1192_v9 = vld [vmem:[%s182_s11] sm:$0xff]   ;;  %v1193_v10 = vld [vmem:[%s182_s11 + $0x8] ss:$0 sps:$4 sm:$0x11]   ;;  %v495_v37 = vadd.s32 96, %v1459_v32  ;;  %v494_v43 = vadd.s32 88, %v1459_v32 }
  0x2d   : > { %1043 = vmatprep.subr.bf16.mxu0 %v1322_v0  ;;  %1057 = vmatprep.subr.bf16.mxu1 %v1322_v0  ;;  %v216_v13 = vshrl.u32 %v1192_v9, 16  ;;  %v218_v14 = vshll.u32 %v1192_v9, 16  ;;  %v223_v15 = vshll.u32 %v1193_v10, 16  ;;  %v387_v28 = vrot.slane %v1192_v9, 1  ;;  %p1598_p6 = scmp.ne.s32.totalorder %s1371_s16, 0 }
  0x2e   : > { %v388_v29 = vrot.slane %v1193_v10, 1  ;;  %v608_v38 = vand.u32 7, %v498_v34  ;;  %v601_v39 = vand.u32 7, %v497_v35  ;;  %v594_v40 = vand.u32 7, %v496_v36 }
  0x2f   : > { %v220_v16 = vrot.slane %v218_v14, 1  ;;  %v225_v18 = vrot.slane %v223_v15, 1  ;;  %v587_v41 = vand.u32 7, %v495_v37  ;;  %v580_v44 = vand.u32 7, %v494_v43 }
  0x30   : > { %1044 = vmatpush3.bf16.msra.mxu0 %v1186_v7  ;;  %1058 = vmatpush3.bf16.msra.mxu1 %v1187_v8  ;;  %v389_v30 = vsel %vm386_vm4, %v387_v28, %v388_v29  ;;  %vm708_vm5 = vcmp.eq.s32.totalorder %v608_v38, %v1461_v33  ;;  %vm707_vm6 = vcmp.eq.s32.totalorder %v601_v39, %v1461_v33  ;;  %v493_v45 = vadd.s32 80, %v1459_v32 }
  0x31   : > { %1045 = vmatprep.subr.bf16.mxu0 %v1322_v0  ;;  %1059 = vmatprep.subr.bf16.mxu1 %v1322_v0  ;;  %v221_v20 = vor.u32 %v220_v16, %v216_v13  ;;  %vm706_vm7 = vcmp.eq.s32.totalorder %v594_v40, %v1461_v33  ;;  %vm705_vm8 = vcmp.eq.s32.totalorder %v587_v41, %v1461_v33  ;;  %v492_v47 = vadd.s32 72, %v1459_v32 }
  0x32   : > { %vm704_vm9 = vcmp.eq.s32.totalorder %v580_v44, %v1461_v33  ;;  %v573_v46 = vand.u32 7, %v493_v45  ;;  %v491_v49 = vadd.s32 64, %v1459_v32  ;;  %v490_v51 = vadd.s32 56, %v1459_v32 }
  0x33   : > { %v226_v22 = vsel %vm214_vm2, %v221_v20, %v225_v18  ;;  %v566_v48 = vand.u32 7, %v492_v47  ;;  %v489_v53 = vadd.s32 48, %v1459_v32  ;;  %v488_v55 = vadd.s32 40, %v1459_v32 }
  0x34   : > { %1046 = vmatpush3.bf16.msra.mxu0 %v1188_v11  ;;  %1060 = vmatpush3.bf16.msra.mxu1 %v1189_v12  ;;  %vm703_vm10 = vcmp.eq.s32.totalorder %v573_v46, %v1461_v33  ;;  %v559_v50 = vand.u32 7, %v491_v49  ;;  %v552_v52 = vand.u32 7, %v490_v51  ;;  %v487_v57 = vadd.s32 32, %v1459_v32 }
  0x35   : > { %1047 = vmatprep.subr.bf16.mxu0 %v1322_v0  ;;  %1061 = vmatprep.subr.bf16.mxu1 %v1322_v0  ;;  %vm702_vm11 = vcmp.eq.s32.totalorder %v566_v48, %v1461_v33  ;;  %v545_v54 = vand.u32 7, %v489_v53  ;;  %v538_v56 = vand.u32 7, %v488_v55  ;;  %v486_v59 = vadd.s32 24, %v1459_v32 }
  0x36   : > { %vm701_vm12 = vcmp.eq.s32.totalorder %v559_v50, %v1461_v33  ;;  %vm700_vm13 = vcmp.eq.s32.totalorder %v552_v52, %v1461_v33  ;;  %v531_v58 = vand.u32 7, %v487_v57  ;;  %v485_v61 = vadd.s32 16, %v1459_v32 }
  0x37   : > { %vm699_vm14 = vcmp.eq.s32.totalorder %v545_v54, %v1461_v33  ;;  %vm698_vm15 = vcmp.eq.s32.totalorder %v538_v56, %v1461_v33  ;;  %v524_v60 = vand.u32 7, %v486_v59  ;;  %v484_v63 = vadd.s32 8, %v1459_v32 }
  0x38   : > { %1048 = vmatpush3.bf16.msra.mxu0 %v1190_v17  ;;  %1062 = vmatpush3.bf16.msra.mxu1 %v1191_v19  ;;  %v517_v62 = vand.u32 7, %v485_v61  ;;  %v503_v1 = vand.u32 7, %v1459_v32 }
  0x39   : > { %1067 = vmatprep.subr.bf16.mxu0 %v1322_v0  ;;  %1081 = vmatprep.subr.mxu1 %v1322_v0  ;;  %vm696_vm1 = vcmp.eq.s32.totalorder %v524_v60, %v1461_v33  ;;  %v510_v2 = vand.u32 7, %v484_v63 }
  0x3a   : > { %vm695_vm2 = vcmp.eq.s32.totalorder %v517_v62, %v1461_v33  ;;  %vm693_vm4 = vcmp.eq.s32.totalorder %v503_v1, %v1461_v33 }
  0x3b   : > { %1050 = vmatmul.mubr.msk.bf16.vlgmr.msra.gmra.mxu0 %vm254_vm3, %v226_v22  ;;  %1064 = vmatmul.mubr.msk.bf16.vlgmr.msra.gmra.mxu1 %vm254_vm3, %v1192_v9 }
  0x3c   : > { %1068 = vmatpush3.bf16.msra.mxu0 %v421_v23  ;;  %1077 = vmatprep.mubr.msk.bf16.mxu0 %vm1323_vm0, %v1322_v0 }
  0x3d   : > { %1069 = vmatprep.subr.bf16.mxu0 %v1322_v0  ;;  %1113 = vmatprep.mubr.msk.f32.mxu1 %vm1323_vm0, %v1322_v0  ;;  %vm697_vm0 = vcmp.eq.s32.totalorder %v531_v58, %v1461_v33 }
  0x3e   : > { %1082 = vmatpush3.msk.msra.mxu1 %vm708_vm5, %v1324_v42  ;;  %vm741_vm5 = vcmask 1040384  }
  0x3f   : > { %1083 = vmatprep.subr.mxu1 %v1322_v0 }
  0x40   : > { %1070 = vmatpush3.bf16.msra.mxu0 %v1195_v24  ;;  %1084 = vmatpush3.msk.msra.mxu1 %vm707_vm6, %v1324_v42 }
  0x41   : > { %1071 = vmatprep.subr.bf16.mxu0 %v1322_v0  ;;  %1085 = vmatprep.subr.mxu1 %v1322_v0 }
  0x42   : > { %1086 = vmatpush3.msk.msra.mxu1 %vm706_vm7, %v1324_v42 }
  0x43   : > { %1087 = vmatprep.subr.mxu1 %v1322_v0 }
  0x44   : > { %1072 = vmatpush3.bf16.msra.mxu0 %v1196_v25  ;;  %1088 = vmatpush3.msk.msra.mxu1 %vm705_vm8, %v1324_v42 }
  0x45   : > { %1073 = vmatprep.subr.bf16.mxu0 %v1322_v0  ;;  %1089 = vmatprep.subr.mxu1 %v1322_v0 }
  0x46   : > { %1090 = vmatpush3.msk.msra.mxu1 %vm704_vm9, %v1324_v42 }
  0x47   : > { %1091 = vmatprep.subr.mxu1 %v1322_v0 }
  0x48   : > { %1074 = vmatpush3.bf16.msra.mxu0 %v1197_v26  ;;  %1092 = vmatpush3.msk.msra.mxu1 %vm703_vm10, %v1324_v42 }
  0x49   : > { %1075 = vmatprep.subr.bf16.mxu0 %v1322_v0  ;;  %1093 = vmatprep.subr.mxu1 %v1322_v0 }
  0x4a   : > { %1094 = vmatpush3.msk.msra.mxu1 %vm702_vm11, %v1324_v42 }
  0x4b   : > { %1095 = vmatprep.subr.mxu1 %v1322_v0 }
  0x4c   : > { %1076 = vmatpush3.bf16.msra.mxu0 %v1198_v27  ;;  %1096 = vmatpush3.msk.msra.mxu1 %vm701_vm12, %v1324_v42 }
  0x4d   : > { %1097 = vmatprep.subr.mxu1 %v1322_v0 }
  0x4e   : > { %1098 = vmatpush3.msk.msra.mxu1 %vm700_vm13, %v1324_v42 }
  0x4f   : > { %1078 = vmatmul.mubr.msk.bf16.vlgmr.msra.gmra.mxu0 %vm254_vm3, %v389_v30  ;;  %1099 = vmatprep.subr.mxu1 %v1322_v0  ;;  %vm694_vm3 = vcmp.eq.s32.totalorder %v510_v2, %v1461_v33 }
  0x50   : > { %1100 = vmatpush3.msk.msra.mxu1 %vm699_vm14, %v1324_v42 }
  0x51   : > { %1101 = vmatprep.subr.mxu1 %v1322_v0 }
  0x52   : > { %1102 = vmatpush3.msk.msra.mxu1 %vm698_vm15, %v1324_v42 }
  0x53   : > { %1103 = vmatprep.subr.mxu1 %v1322_v0 }
  0x54   : > { %1104 = vmatpush3.msk.msra.mxu1 %vm697_vm0, %v1324_v42 }
  0x55   : > { %1105 = vmatprep.subr.mxu1 %v1322_v0 }
  0x56   : > { %1106 = vmatpush3.msk.msra.mxu1 %vm696_vm1, %v1324_v42 }
  0x57   : > { %1107 = vmatprep.subr.mxu1 %v1322_v0 }
  0x58   : > { %1108 = vmatpush3.msk.msra.mxu1 %vm695_vm2, %v1324_v42 }
  0x59   : > { %1109 = vmatprep.subr.mxu1 %v1322_v0 }
  0x5a   : > { %1110 = vmatpush3.msk.msra.mxu1 %vm694_vm3, %v1324_v42 }
  0x5b   : > { %1111 = vmatprep.subr.mxu1 %v1322_v0 }
  0x5c   : > { %1112 = vmatpush3.msk.msra.mxu1 %vm693_vm4, %v1324_v42 }
  0xfb   : > { %v296_v3 = vpop.f32.mrf.mxu0  ;;  %v369_v4 = vpop.f32.mrf.mxu1 }
  0xfc   : > { %v370_v12 = vadd.f32 %v369_v4, %v296_v3 }
  0xfd   : > { %v1051_v5 = vpop.f32.mrf.mxu0  ;;  %v1065_v6 = vpop.f32.mrf.mxu1 }
  0xff   : > { %v299_v7 = vpop.f32.mrf.mxu0  ;;  %v372_v8 = vpop.f32.mrf.mxu1 }
 0x100   : > { %v373_v14 = vadd.f32 %v372_v8, %v299_v7 }
 0x101   : > { %v1052_v9 = vpop.f32.mrf.mxu0  ;;  %v1066_v10 = vpop.f32.mrf.mxu1 }
 0x10f   : > { %v457_v11 = vpop.f32.mrf.mxu0 }
 0x110   : > { %v464_v15 = vadd.f32 %v457_v11, %v370_v12 }
 0x111   : > { %v1079_v13 = vpop.f32.mrf.mxu0 }
 0x112   : > { %v473_v19 = vmul.f32 %v464_v15, %v464_v15 }
 0x113   : > { %v460_v16 = vpop.f32.mrf.mxu0 }
 0x114   : > { %v465_v17 = vadd.f32 %v460_v16, %v373_v14 }
 0x115   : > { %v1080_v18 = vpop.f32.mrf.mxu0 }
 0x116   : > { %v466_v0 = vadd.f32 %v465_v17, %v464_v15  ;;  %v474_v20 = vmul.f32 %v465_v17, %v465_v17 }
 0x118   : > { %v467_v21 = vrot.slane %v466_v0, 4  ;;  %v475_v22 = vadd.f32 %v474_v20, %v473_v19 }
 0x11a   : > { %v468_v23 = vadd.f32 %v467_v21, %v466_v0  ;;  %v476_v24 = vrot.slane %v475_v22, 4 }
 0x11c   : > { %v469_v25 = vrot.slane %v468_v23, 2  ;;  %v477_v26 = vadd.f32 %v476_v24, %v475_v22 }
 0x11e   : > { %v470_v27 = vadd.f32 %v469_v25, %v468_v23  ;;  %v478_v28 = vrot.slane %v477_v26, 2 }
 0x120   : > { %v471_v29 = vrot.slane %v470_v27, 1  ;;  %v479_v30 = vadd.f32 %v478_v28, %v477_v26 }
 0x122   : > { %v480_v31 = vrot.slane %v479_v30, 1  ;;  %v472_v32 = vadd.f32 %v471_v29, %v470_v27 }
 0x124   : > { %v481_v33 = vadd.f32 %v480_v31, %v479_v30 }
 0x126   : > { %v742_v34 = vsel %vm741_vm5, %v472_v32, %v481_v33 }
 0x127   : > { %1114 = vmatmul.mubr.f32.vlgmr.msra.gmra.mxu1 %v742_v34 }
 0x1e5   : > { %816 = sbr.rel (%p1598_p6) target bundleno = 492 (0x1ec), region = 36 }
 0x1e7   : > { %v809_v35 = vpop.f32.mrf.mxu1 }
 0x1e9   : > { %v1115_v36 = vpop.f32.mrf.mxu1 }
 0x1ea   : > { %vm817_vm6 = vcmask 58368   ;;  %v1325_v37 = vmov 0.0  }
 0x1eb   : > { %818 = vst.msk [vmem:[#allocation6] sm:$0x3] %vm817_vm6, %v1325_v37 }
 0x1ec PF: > { %vm821_vm7 = vcmask 58368   ;;  %823 = vst [vmem:[%s175_s17] sm:$0xff] %v464_v15  ;;  %824 = vst [vmem:[%s175_s17 + $0x8] sm:$0xff] %v465_v17  ;;  %s1003_s19 = sshll.u32 %s1371_s16, 8  ;;  %s839_s26 = sshll.u32 %s175_s17, 4  ;;  %s1535_s26 = int_to_ptr.vmem [resolvable:$true] %s839_s26 }
 0x1ed   : > { %s1533_s25 = scalar_lea.hbm %s1592_s2, %s1003_s19  ;;  %s1539_s27 = scalar_lea.sflag [#allocation4], %s173_s5 }
 0x1ee   : > { %s1225_s28 = scalar_lea.vmem %s1535_s26, 256  ;;  %s1326_s29 = smov [#allocation5]  }
 0x1ef   : > { %p1226_p8 = scmp.ne.s32.totalorder %s1535_s26, %s1225_s28  ;;  %s1229_s30 = sshll.u32 %s1326_s29, 4  ;;  %s1230_s30 = int_to_ptr.vmem [resolvable:$false] %s1229_s30 }
 0x1f0   : > { %s1231_s4 = scalar_lea.vmem %s1230_s30, 512  ;;  %p1232_p11 = scmp.lt.s32.totalorder %s1535_s26, %s1230_s30 }
 0x1f1   : > { %p1227_p9 = pnand %p1226_p8, %p1390_p5  ;;  %p1233_p12 = scmp.lt.s32.totalorder %s1231_s4, %s1225_s28 }
 0x1f2   : > { %v819_v38 = vld [vmem:[#allocation6] sm:$0x3] }
 0x1f3   : > { %v820_v39 = vadd.f32 %v819_v38, %v809_v35  ;;  %p1228_p10 = pneg %p1227_p9  ;;  %p1234_p13 = por %p1233_p12, %p1232_p11 }
 0x1f5   : > { %822 = vst.msk [vmem:[#allocation6] sm:$0x3] %vm821_vm7, %v820_v39  ;;  %p1235_p0 = pnand %p1234_p13, %p1228_p10 }
 0x1f7   : > { %1238 = shalt.err (!%p1235_p0)
}
 0x1f8   : > { %s1239_s5 = scalar_lea.hbm %s1533_s25, 256  ;;  %s1243_s8 = scalar_lea.hbm %s1592_s2, 512 }
 0x1f9   : > { %p1240_p1 = scmp.ne.s32.totalorder %s1533_s25, %s1239_s5  ;;  %p1244_p7 = scmp.lt.s32.totalorder %s1533_s25, %s1592_s2 }
 0x1fa   : > { %p1245_p2 = scmp.lt.s32.totalorder %s1243_s8, %s1239_s5 }
 0x1fb   : > { %p1241_p3 = pnand %p1240_p1, %p1390_p5 }
 0x1fc   : > { %p1246_p6 = por %p1245_p2, %p1244_p7 }
 0x1fd   : > { %p1242_p4 = pneg %p1241_p3 }
 0x1ff   : > { %p1247_p8 = pnand %p1246_p6, %p1242_p4 }
 0x201   : > { %1250 = shalt.err (!%p1247_p8)
}
 0x202   : > { %s1327_s11 = smov 128   ;;  %s1328_s17 = smov 8  }
 0x203   : > { %1121 = dma.vmem_to_hbm [thread:$0]  (%p1390_p5), %s1535_s26, 256, %s1533_s25, %s1539_s27, %s1327_s11, %s1327_s11, %s1328_s17  }
 0x204   : > { %s1329_s19 = smov [#allocation6]   ;;  %p1599_p10 = scmp.eq.s32.totalorder %s1371_s16, 1 }
 0x205   : > { %s853_s20 = sshll.u32 %s1329_s19, 4  ;;  %s854_s20 = int_to_ptr.vmem [resolvable:$true] %s853_s20 }
 0x206   : > { %s1251_s24 = scalar_lea.vmem %s854_s20, 32  ;;  %p1258_p13 = scmp.lt.s32.totalorder %s854_s20, %s854_s20 }
 0x207   : > { %p1252_p9 = scmp.ne.s32.totalorder %s854_s20, %s1251_s24  ;;  %p1259_p0 = scmp.lt.s32.totalorder %s1251_s24, %s1251_s24 }
 0x209   : > { %p1253_p11 = pnand %p1252_p9, %p1599_p10  ;;  %p1260_p1 = por %p1259_p0, %p1258_p13 }
 0x20b   : > { %p1254_p12 = pneg %p1253_p11 }
 0x20d   : > { %p1261_p3 = pnand %p1260_p1, %p1254_p12 }
 0x20f   : > { %1264 = shalt.err (!%p1261_p3)
}
 0x210   : > { %p1600_p4 = pmov %p1599_p10 }
 0x212   : > { %1123 = dma.vmem_to_hbm [thread:$0]  (%p1600_p4), %s854_s20, 32, %s1593_s3, [#allocation7]  }
 0x213   : > { %p1601_p5 = pmov %p1600_p4 }
 0x214   : > { %p1602_p7 = pmov %p1600_p4 }
 0x215   : > { %1296 = dma.done.wait (%p1601_p5), [#allocation7], 32  }
 0x216   : > { %1298 = vsyncadd (%p1602_p7), [#allocation7], 4294967264 }
 0x217 PF: > { %p1139_p2 = scmp.ge.s32.totalorder %s1317_s15, 2  ;;  %s869_s22 = sand.u32 1, %s1305_s12  }
 0x218   : > { %p1603_p6 = scmp.ne.s32.totalorder %s1596_s23, 0  ;;  %s870_s25 = scalar_lea.sflag [#allocation4], %s869_s22 }
 0x21a   : > { %p1132_p8 = pnand %p1139_p2, %p1603_p6 }
 0x21c   : > { %p1133_p9 = pneg %p1132_p8 }
 0x21e   : > { %1300 = dma.done.wait (%p1133_p9), %s870_s25, 256  }
 0x21f   : > { %1302 = vsyncadd (%p1133_p9), %s870_s25, 4294967040  ;;  %p16_p10 = scmp.ge.s32.totalorder %s1375_s18, 4   ;;  %s1604_s12 = smov %s1309_s13 }
 0x220   : > { %s1605_s13 = smov %s1313_s14  ;;  %s1606_s14 = smov %s1386_s21 }
 0x221   : > { %s1607_s15 = smov %s1375_s18  ;;  %18 = sbr.rel (!%p16_p10) target bundleno = 5 (0x5), region = 82 }
 0x226   :  { %875 = vsyncpa [#allocation3], 1 }
 0x227   :  { %877 = vsyncpa [#allocation3 + $0x1], 1 }
 0x228   :  { %878 = vsyncpa [#allocation4], 1 }
 0x229   :  { %880 = vsyncpa [#allocation4 + $0x1], 1 }
 0x22a   :  { %881 = vsyncpa [#allocation7], 1 }

</bundles_post_ra>
